<compile_context>
chip_gen: v7x
topology: tpu7x:2x2x1
jax: 0.10.0
libtpu: 0.0.40
codegen_flags: <defaults>
</compile_context>

<pallas_src>
import jax
import jax.numpy as jnp
from jax.experimental import pallas as pl
from jax.experimental.pallas import tpu as pltpu

IN_DIM = 784
HID = 240
HID_PAD = 256  # 240 padded to a clean multiple of 128 (one 256-wide MXU tile)


def _round_up(x, m):
    return (x + m - 1) // m * m


def _discriminator_kernel(x_ref, w1_ref, b1_ref, w2_ref, b2_ref,
                          w3_ref, b3_ref, o_ref):
    """One batch tile: two bf16 MXU matmuls + VPU/XLU final layer, f32 epilogues."""
    # Cast activations to bf16 in-kernel (keeps the HBM x stream at its native
    # width); MXU accumulates in f32 via preferred_element_type.
    x = x_ref[...].astype(jnp.bfloat16)                          # (TB, 784)

    # hidden1 + LeakyReLU(0.2)
    h1 = jnp.dot(x, w1_ref[...], preferred_element_type=jnp.float32)
    h1 = h1 + b1_ref[...]                                        # (TB,256)+(1,256)
    h1 = jnp.maximum(h1, 0.2 * h1)

    # hidden2 + LeakyReLU(0.2)
    h2 = jnp.dot(h1.astype(jnp.bfloat16), w2_ref[...],
                 preferred_element_type=jnp.float32)
    h2 = h2 + b2_ref[...]
    h2 = jnp.maximum(h2, 0.2 * h2)

    # output layer (256 -> 1): keep the degenerate N=1 matmul off the MXU —
    # VPU multiply + XLU lane reduction; scalar bias from SMEM; sigmoid on the
    # EUP.  Result is stored lane-dense as a (1, 1, TB) row.
    logits = jnp.sum(h2 * w3_ref[...], axis=-1) + b3_ref[0]      # (TB,) f32
    o_ref[0, 0, :] = pl.reciprocal(1.0 + jnp.exp(-logits), approx=True)


def _forward_impl(x, w1p, b1p, w2p, b2p, w3p, b3p):
    """x: (B,1,28,28) or (B,784); params pre-padded/cast via prepare_params."""
    batch = x.shape[0]
    x2d = x.reshape(batch, -1)
    assert x2d.shape[1] == IN_DIM

    # Big batch tile to amortize the ~0.35us/step grid overhead; capped at half
    # the batch for large batches so v7x's two TensorCores both get grid steps.
    tb = min(2048, _round_up(batch, 8))
    if batch >= 1024:
        tb = min(tb, _round_up((batch + 1) // 2, 8))
    b_pad = _round_up(batch, tb)
    grid = (b_pad // tb,)

    # Only pad the batch if needed (no dtype cast here — done in-kernel).
    if b_pad != batch:
        x2d = jnp.pad(x2d, ((0, b_pad - batch), (0, 0)))

    resident = lambda shape: pl.BlockSpec(shape, lambda i: (0, 0))

    itemsize = jnp.dtype(x2d.dtype).itemsize
    flops = 2 * b_pad * (IN_DIM * HID_PAD + HID_PAD * HID_PAD + HID_PAD)
    bytes_accessed = (b_pad * IN_DIM * itemsize                  # x
                      + (IN_DIM + HID_PAD) * HID_PAD * 2         # w1, w2 (bf16)
                      + 3 * HID_PAD * 4 + 4                      # biases + w3 (f32)
                      + b_pad * 4)                               # output (f32)

    out = pl.pallas_call(
        _discriminator_kernel,
        out_shape=jax.ShapeDtypeStruct((grid[0], 1, tb), jnp.float32),
        grid=grid,
        in_specs=[
            pl.BlockSpec((tb, IN_DIM), lambda i: (i, 0)),        # x tile (pipelined)
            resident((IN_DIM, HID_PAD)),                         # w1 (VMEM-resident)
            resident((1, HID_PAD)),                              # b1
            resident((HID_PAD, HID_PAD)),                        # w2
            resident((1, HID_PAD)),                              # b2
            resident((1, HID_PAD)),                              # w3 as a row
            pl.BlockSpec(memory_space=pltpu.MemorySpace.SMEM),   # b3 scalar
        ],
        out_specs=pl.BlockSpec((1, 1, tb), lambda i: (i, 0, 0)), # lane-dense row
        compiler_params=pltpu.CompilerParams(
            dimension_semantics=("parallel",),
            vmem_limit_bytes=48 * 1024 * 1024),
        cost_estimate=pl.CostEstimate(
            flops=flops, transcendentals=b_pad, bytes_accessed=bytes_accessed),
    )(x2d, w1p, b1p, w2p, b2p, w3p, b3p)

    return out.reshape(b_pad)[:batch].reshape(batch, 1)


discriminator_forward = jax.jit(_forward_impl)


def prepare_params(w1, b1, w2, b2, w3, b3):
    """One-time pad (240 -> 256) + bf16 cast, hoisted off the per-call path."""
    pad = HID_PAD - HID
    w1p = jnp.pad(w1, ((0, 0), (0, pad))).astype(jnp.bfloat16)              # (784,256)
    b1p = jnp.pad(b1.reshape(1, HID).astype(jnp.float32), ((0, 0), (0, pad)))  # (1,256)
    w2p = jnp.pad(w2, ((0, pad), (0, pad))).astype(jnp.bfloat16)            # (256,256)
    b2p = jnp.pad(b2.reshape(1, HID).astype(jnp.float32), ((0, 0), (0, pad)))  # (1,256)
    w3p = jnp.pad(w3.reshape(1, HID).astype(jnp.float32), ((0, 0), (0, pad)))  # (1,256)
    b3p = b3.reshape(1).astype(jnp.float32)                                 # (1,)
    return w1p, b1p, w2p, b2p, w3p, b3p


def init_params(key):
    """PyTorch nn.Linear-style init (U[-1/sqrt(fan_in), 1/sqrt(fan_in)]).

    Weights stored as (in_features, out_features), i.e. transposed vs. PyTorch.
    """
    ks = jax.random.split(key, 6)

    def linear(kw, kb, fan_in, fan_out):
        bound = 1.0 / jnp.sqrt(jnp.float32(fan_in))
        w = jax.random.uniform(kw, (fan_in, fan_out), jnp.float32, -bound, bound)
        b = jax.random.uniform(kb, (fan_out,), jnp.float32, -bound, bound)
        return w, b

    w1, b1 = linear(ks[0], ks[1], IN_DIM, HID)
    w2, b2 = linear(ks[2], ks[3], HID, HID)
    w3, b3 = linear(ks[4], ks[5], HID, 1)
    return w1, b1, w2, b2, w3, b3


def _reference_forward(x, w1, b1, w2, b2, w3, b3):
    x2d = x.reshape(x.shape[0], -1).astype(jnp.float32)
    h1 = jax.nn.leaky_relu(x2d @ w1 + b1, 0.2)
    h2 = jax.nn.leaky_relu(h1 @ w2 + b2, 0.2)
    return jax.nn.sigmoid(h2 @ w3 + b3)


if __name__ == "__main__":
    key = jax.random.PRNGKey(0)
    k_x, k_p = jax.random.split(key)

    # MNIST-like batch: (B, 1, 28, 28) NCHW, flattened to 784 in forward.
    x = jax.random.normal(k_x, (8, 1, 28, 28), dtype=jnp.float32)
    params = init_params(k_p)
    prepped = prepare_params(*params)          # one-time pad + bf16 cast

    out = jax.block_until_ready(discriminator_forward(x, *prepped))
    ref = _reference_forward(x, *params)

    assert out.shape == (8, 1)
    # bf16 MXU inputs (f32 accumulation) + approx reciprocal -> loosened tol.
    max_diff = jnp.max(jnp.abs(out - ref))
    assert jnp.allclose(out, ref, atol=2e-2, rtol=0.0), (
        f"mismatch vs JAX reference, max abs diff = {max_diff}")

    print("KERNEL_OK")
</pallas_src>

<mosaic_0001>
module attributes {stable_mosaic.version = 11 : i64} {
  func.func @_discriminator_kernel(%arg0: i32, %arg1: memref<8x784xf32, #tpu.memory_space<vmem>>, %arg2: memref<784x256xbf16, #tpu.memory_space<vmem>>, %arg3: memref<1x256xf32, #tpu.memory_space<vmem>>, %arg4: memref<256x256xbf16, #tpu.memory_space<vmem>>, %arg5: memref<1x256xf32, #tpu.memory_space<vmem>>, %arg6: memref<1x256xf32, #tpu.memory_space<vmem>>, %arg7: memref<1xf32, #tpu.memory_space<smem>>, %arg8: memref<1x1x8xf32, #tpu.memory_space<vmem>>) attributes {dimension_semantics = [#tpu.dimension_semantics<parallel>], iteration_bounds = array<i64: 1>, scalar_prefetch = 0 : i64, scratch_operands = 0 : i64, tpu.core_type = #tpu.core_type<tc>, window_params = [{transform_indices = @transform_0, window_bounds = array<i64: 8, 784>}, {pipeline_mode = #tpu.pipeline_mode<synchronous>, transform_indices = @transform_1, window_bounds = array<i64: 784, 256>}, {pipeline_mode = #tpu.pipeline_mode<synchronous>, transform_indices = @transform_2, window_bounds = array<i64: 1, 256>}, {pipeline_mode = #tpu.pipeline_mode<synchronous>, transform_indices = @transform_3, window_bounds = array<i64: 256, 256>}, {pipeline_mode = #tpu.pipeline_mode<synchronous>, transform_indices = @transform_4, window_bounds = array<i64: 1, 256>}, {pipeline_mode = #tpu.pipeline_mode<synchronous>, transform_indices = @transform_5, window_bounds = array<i64: 1, 256>}, {transform_indices = @transform_6, window_bounds = array<i64: 1>}, {transform_indices = @transform_7, window_bounds = array<i64: 1, 1, 8>}]} {
    %c0 = arith.constant 0 : index
    %c0_0 = arith.constant 0 : index
    %0 = vector.load %arg1[%c0, %c0_0] : memref<8x784xf32, #tpu.memory_space<vmem>>, vector<8x784xf32>
    %1 = arith.truncf %0 : vector<8x784xf32> to vector<8x784xbf16>
    %c0_1 = arith.constant 0 : index
    %c0_2 = arith.constant 0 : index
    %2 = vector.load %arg2[%c0_1, %c0_2] : memref<784x256xbf16, #tpu.memory_space<vmem>>, vector<784x256xbf16>
    %cst = arith.constant dense<0.000000e+00> : vector<8x256xf32>
    %3 = tpu.matmul %1, %2, %cst {dimension_numbers = #tpu.dot_dimension_numbers<[1], [0], [0], [1], [0, 0, 1, 1], [], []>} : vector<8x784xbf16>, vector<784x256xbf16>, vector<8x256xf32> -> vector<8x256xf32>
    %c0_3 = arith.constant 0 : index
    %c0_4 = arith.constant 0 : index
    %4 = vector.load %arg3[%c0_3, %c0_4] : memref<1x256xf32, #tpu.memory_space<vmem>>, vector<1x256xf32>
    %5 = vector.broadcast %4 : vector<1x256xf32> to vector<8x256xf32>
    %6 = arith.addf %3, %5 : vector<8x256xf32>
    %cst_5 = arith.constant 2.000000e-01 : f32
    %7 = vector.broadcast %cst_5 : f32 to vector<8x256xf32>
    %8 = arith.mulf %7, %6 : vector<8x256xf32>
    %9 = arith.maximumf %6, %8 : vector<8x256xf32>
    %10 = arith.truncf %9 : vector<8x256xf32> to vector<8x256xbf16>
    %c0_6 = arith.constant 0 : index
    %c0_7 = arith.constant 0 : index
    %11 = vector.load %arg4[%c0_6, %c0_7] : memref<256x256xbf16, #tpu.memory_space<vmem>>, vector<256x256xbf16>
    %cst_8 = arith.constant dense<0.000000e+00> : vector<8x256xf32>
    %12 = tpu.matmul %10, %11, %cst_8 {dimension_numbers = #tpu.dot_dimension_numbers<[1], [0], [0], [1], [0, 0, 1, 1], [], []>} : vector<8x256xbf16>, vector<256x256xbf16>, vector<8x256xf32> -> vector<8x256xf32>
    %c0_9 = arith.constant 0 : index
    %c0_10 = arith.constant 0 : index
    %13 = vector.load %arg5[%c0_9, %c0_10] : memref<1x256xf32, #tpu.memory_space<vmem>>, vector<1x256xf32>
    %14 = vector.broadcast %13 : vector<1x256xf32> to vector<8x256xf32>
    %15 = arith.addf %12, %14 : vector<8x256xf32>
    %cst_11 = arith.constant 2.000000e-01 : f32
    %16 = vector.broadcast %cst_11 : f32 to vector<8x256xf32>
    %17 = arith.mulf %16, %15 : vector<8x256xf32>
    %18 = arith.maximumf %15, %17 : vector<8x256xf32>
    %c0_12 = arith.constant 0 : index
    %c0_13 = arith.constant 0 : index
    %19 = vector.load %arg6[%c0_12, %c0_13] : memref<1x256xf32, #tpu.memory_space<vmem>>, vector<1x256xf32>
    %20 = vector.broadcast %19 : vector<1x256xf32> to vector<8x256xf32>
    %21 = arith.mulf %18, %20 : vector<8x256xf32>
    %cst_14 = arith.constant dense<0.000000e+00> : vector<8xf32>
    %22 = vector.multi_reduction <add>, %21, %cst_14 [1] : vector<8x256xf32> to vector<8xf32>
    %c0_15 = arith.constant 0 : index
    %23 = memref.load %arg7[%c0_15] : memref<1xf32, #tpu.memory_space<smem>>
    %24 = vector.broadcast %23 : f32 to vector<8xf32>
    %25 = arith.addf %22, %24 : vector<8xf32>
    %cst_16 = arith.constant 0.000000e+00 : f32
    %26 = vector.broadcast %cst_16 : f32 to vector<8xf32>
    %27 = arith.subf %26, %25 : vector<8xf32>
    %28 = math.exp %27 : vector<8xf32>
    %cst_17 = arith.constant 1.000000e+00 : f32
    %29 = vector.broadcast %cst_17 : f32 to vector<8xf32>
    %30 = arith.addf %29, %28 : vector<8xf32>
    %31 = tpu.reciprocal %30 {approx = true} : vector<8xf32> -> vector<8xf32>
    %c0_18 = arith.constant 0 : index
    %c0_19 = arith.constant 0 : index
    %c0_20 = arith.constant 0 : index
    %32 = vector.load %arg8[%c0_18, %c0_19, %c0_20] : memref<1x1x8xf32, #tpu.memory_space<vmem>>, vector<1x1x8xf32>
    %33 = vector.shape_cast %32 : vector<1x1x8xf32> to vector<8xf32>
    %34 = vector.shape_cast %31 : vector<8xf32> to vector<1x1x8xf32>
    tpu.vector_store %arg8[%c0_18, %c0_19, %c0_20], %34 {strides = array<i32>} : memref<1x1x8xf32, #tpu.memory_space<vmem>>, vector<1x1x8xf32>,
    return
  }
  func.func @transform_0(%arg0: i32) -> (i32, i32) {
    %c0_i32 = arith.constant 0 : i32
    %c0_i32_0 = arith.constant 0 : i32
    return %arg0, %c0_i32 : i32, i32
  }
  func.func @transform_1(%arg0: i32) -> (i32, i32) {
    %c0_i32 = arith.constant 0 : i32
    %c0_i32_0 = arith.constant 0 : i32
    %c0_i32_1 = arith.constant 0 : i32
    return %c0_i32, %c0_i32_0 : i32, i32
  }
  func.func @transform_2(%arg0: i32) -> (i32, i32) {
    %c0_i32 = arith.constant 0 : i32
    %c0_i32_0 = arith.constant 0 : i32
    %c0_i32_1 = arith.constant 0 : i32
    return %c0_i32, %c0_i32_0 : i32, i32
  }
  func.func @transform_3(%arg0: i32) -> (i32, i32) {
    %c0_i32 = arith.constant 0 : i32
    %c0_i32_0 = arith.constant 0 : i32
    %c0_i32_1 = arith.constant 0 : i32
    return %c0_i32, %c0_i32_0 : i32, i32
  }
  func.func @transform_4(%arg0: i32) -> (i32, i32) {
    %c0_i32 = arith.constant 0 : i32
    %c0_i32_0 = arith.constant 0 : i32
    %c0_i32_1 = arith.constant 0 : i32
    return %c0_i32, %c0_i32_0 : i32, i32
  }
  func.func @transform_5(%arg0: i32) -> (i32, i32) {
    %c0_i32 = arith.constant 0 : i32
    %c0_i32_0 = arith.constant 0 : i32
    %c0_i32_1 = arith.constant 0 : i32
    return %c0_i32, %c0_i32_0 : i32, i32
  }
  func.func @transform_6(%arg0: i32) -> i32 {
    %c0_i32 = arith.constant 0 : i32
    %c0_i32_0 = arith.constant 0 : i32
    return %c0_i32 : i32
  }
  func.func @transform_7(%arg0: i32) -> (i32, i32, i32) {
    %c0_i32 = arith.constant 0 : i32
    %c0_i32_0 = arith.constant 0 : i32
    %c0_i32_1 = arith.constant 0 : i32
    return %arg0, %c0_i32, %c0_i32_0 : i32, i32, i32
  }
}

</mosaic_0001>

<bundles_post_ra>
// kernel: _forward_impl.1
= control target key start
LH: loop header
LB: loop body
LE: loop exit
PB: predicated region body
PF: predicated region fallthrough
CT: control target
= control target key end

     0   :  { %13 = vsyncpa [#allocation4], 0  ;;  %s1921_s0 = inlined_call_operand.vmem [shape: f32[8,784], index: 0, kind: input, shape index: {}]   ;;  %s1922_s1 = inlined_call_operand.vmem [shape: bf16[784,256], index: 1, kind: input, shape index: {}]   ;;  %s1923_s2 = inlined_call_operand.vmem [shape: f32[1,256], index: 2, kind: input, shape index: {}]   ;;  %s1924_s3 = inlined_call_operand.hbm [shape: bf16[256,256], index: 3, kind: input, shape index: {}]   ;;  %s1925_s4 = inlined_call_operand.vmem [shape: f32[1,256], index: 4, kind: input, shape index: {}]   ;;  %s1926_s5 = inlined_call_operand.vmem [shape: f32[1,256], index: 5, kind: input, shape index: {}]   ;;  %s1927_s6 = inlined_call_operand.<no memory space> [shape: f32[1], index: 6, kind: input, shape index: {}]   ;;  %s1928_s7 = inlined_call_operand.hbm [shape: f32[1,1,8], index: 7, kind: output, shape index: {}]  }
   0x1   :  { %14 = vsyncpa [#allocation5], 0  ;;  %s1525_s24 = smov [#allocation3]   ;;  %s1477_s28 = scalar_lea.hbm %s1924_s3, 4096 }
   0x2   :  { %s26_s25 = sshll.u32 %s1525_s24, 4  ;;  %p1478_p0 = scmp.ne.s32.totalorder %s1924_s3, %s1477_s28  ;;  %s27_s25 = int_to_ptr.vmem [resolvable:$true] %s26_s25 }
   0x3   :  { %p1481_p1 = scmp.lt.u32.totalorder %s1477_s28, %s1924_s3 }
   0x5   :  { %p1483_p2 = pnand %p1481_p1, %p1478_p0 }
   0x7   :  { %1486 = shalt.err (!%p1483_p2)
}
   0x8   :  { %s1487_s10 = scalar_lea.vmem %s27_s25, 4096  ;;  %p1492_p4 = scmp.lt.s32.totalorder %s27_s25, %s27_s25 }
   0x9   :  { %p1488_p3 = scmp.ne.s32.totalorder %s27_s25, %s1487_s10  ;;  %p1493_p5 = scmp.lt.s32.totalorder %s1487_s10, %s1487_s10 }
   0xb   :  { %p1494_p6 = por %p1493_p5, %p1492_p4 }
   0xd   :  { %p1495_p7 = pnand %p1494_p6, %p1488_p3 }
   0xf   :  { %1498 = shalt.err (!%p1495_p7)
}
  0x10   :  { %s1526_s11 = smov 128   ;;  %s1527_s12 = smov 8  }
  0x11   :  { %32 = dma.hbm_to_vmem [thread:$0]  %s1924_s3, 4096, %s27_s25, [#allocation4], %s1526_s11, %s1526_s11, %s1527_s12  }
  0x12   :  { %1521 = dma.done.wait [#allocation4], 4096  }
  0x13   :  { %1522 = vsyncadd [#allocation4], 4294963200  ;;  %v1278_v0 = vld [vmem:[%s1922_s1 + $0x104] ss:$8 sps:$4 sm:$0xff]   ;;  %v1280_v1 = vld [vmem:[%s1922_s1 + $0x100] ss:$8 sps:$4 sm:$0xff]  }
  0x14   :  { %702 = vmatprep.subr.bf16.mxu0 %v1278_v0  ;;  %v1281_v2 = vld [vmem:[%s1922_s1 + $0x114] ss:$8 sps:$4 sm:$0xff]   ;;  %v1283_v3 = vld [vmem:[%s1922_s1 + $0x110] ss:$8 sps:$4 sm:$0xff]   ;;  %v1284_v4 = vld [vmem:[%s1922_s1 + $0x124] ss:$8 sps:$4 sm:$0xff]  }
  0x15   :  { %703 = vmatpush1.bf16.msra.mxu0 %v1280_v1  ;;  %v1286_v5 = vld [vmem:[%s1922_s1 + $0x120] ss:$8 sps:$4 sm:$0xff]   ;;  %v1287_v6 = vld [vmem:[%s1922_s1 + $0x134] ss:$8 sps:$4 sm:$0xff]   ;;  %v1289_v7 = vld [vmem:[%s1922_s1 + $0x130] ss:$8 sps:$4 sm:$0xff]  }
  0x16   :  { %704 = vmatprep.subr.bf16.mxu0 %v1281_v2  ;;  %v1290_v8 = vld [vmem:[%s1922_s1 + $0x144] ss:$8 sps:$4 sm:$0xff]   ;;  %v1292_v9 = vld [vmem:[%s1922_s1 + $0x140] ss:$8 sps:$4 sm:$0xff]   ;;  %v1293_v10 = vld [vmem:[%s1922_s1 + $0x154] ss:$8 sps:$4 sm:$0xff]  }
  0x17   :  { %v1295_v11 = vld [vmem:[%s1922_s1 + $0x150] ss:$8 sps:$4 sm:$0xff]   ;;  %v1296_v12 = vld [vmem:[%s1922_s1 + $0x164] ss:$8 sps:$4 sm:$0xff]   ;;  %v1298_v15 = vld [vmem:[%s1922_s1 + $0x160] ss:$8 sps:$4 sm:$0xff]  }
  0x18   :  { %v46_v13 = vld [vmem:[%s1921_s0 + $0x18] sm:$0xff]  ;;  %v1332_v17 = vld [vmem:[%s1922_s1 + $0x4] ss:$8 sps:$4 sm:$0xff]   ;;  %v1337_v20 = vld [vmem:[%s1922_s1] ss:$8 sps:$4 sm:$0xff]   ;;  %vm657_vm0 = vcmask 130048  }
  0x19   :  { %705 = vmatpush1.bf16.msra.mxu0 %v1283_v3  ;;  %v53_v14 = vpack.c.bf16 %v46_v13, %v46_v13  ;;  %v1299_v16 = vld [vmem:[%s1922_s1 + $0x174] ss:$8 sps:$4 sm:$0xff]   ;;  %v1301_v18 = vld [vmem:[%s1922_s1 + $0x170] ss:$8 sps:$4 sm:$0xff]   ;;  %v1302_v19 = vld [vmem:[%s1922_s1 + $0x184] ss:$8 sps:$4 sm:$0xff]   ;;  %661 = vmatprep.subr.bf16.mxu1 %v1332_v17 }
  0x1a   :  { %706 = vmatprep.subr.bf16.mxu0 %v1284_v4  ;;  %v1338_v21 = vld [vmem:[%s1922_s1 + $0x14] ss:$8 sps:$4 sm:$0xff]   ;;  %662 = vmatpush1.bf16.msra.mxu1 %v1337_v20  ;;  %v1343_v22 = vld [vmem:[%s1922_s1 + $0x10] ss:$8 sps:$4 sm:$0xff]   ;;  %v1344_v23 = vld [vmem:[%s1922_s1 + $0x24] ss:$8 sps:$4 sm:$0xff]  }
  0x1b   :  { %734 = vmatprep.mubr.bf16.mxu0 %v53_v14  ;;  %663 = vmatprep.subr.bf16.mxu1 %v1338_v21  ;;  %v1304_v24 = vld [vmem:[%s1922_s1 + $0x180] ss:$8 sps:$4 sm:$0xff]   ;;  %v1305_v25 = vld [vmem:[%s1922_s1 + $0x194] ss:$8 sps:$4 sm:$0xff]   ;;  %v1307_v28 = vld [vmem:[%s1922_s1 + $0x190] ss:$8 sps:$4 sm:$0xff]  }
  0x1c   :  { %v1349_v26 = vld [vmem:[%s1922_s1 + $0x20] ss:$8 sps:$4 sm:$0xff]   ;;  %v1350_v27 = vld [vmem:[%s1922_s1 + $0x34] ss:$8 sps:$4 sm:$0xff]   ;;  %v1308_v29 = vld [vmem:[%s1922_s1 + $0x1a4] ss:$8 sps:$4 sm:$0xff]  }
  0x1d   :  { %707 = vmatpush1.bf16.msra.mxu0 %v1286_v5  ;;  %v1355_v30 = vld [vmem:[%s1922_s1 + $0x30] ss:$8 sps:$4 sm:$0xff]   ;;  %v1356_v31 = vld [vmem:[%s1922_s1 + $0x44] ss:$8 sps:$4 sm:$0xff]   ;;  %v1310_v32 = vld [vmem:[%s1922_s1 + $0x1a0] ss:$8 sps:$4 sm:$0xff]  }
  0x1e   :  { %708 = vmatprep.subr.bf16.mxu0 %v1287_v6  ;;  %664 = vmatpush1.bf16.msra.mxu1 %v1343_v22  ;;  %v1311_v33 = vld [vmem:[%s1922_s1 + $0x1b4] ss:$8 sps:$4 sm:$0xff]   ;;  %v1361_v34 = vld [vmem:[%s1922_s1 + $0x40] ss:$8 sps:$4 sm:$0xff]   ;;  %v1313_v36 = vld [vmem:[%s1922_s1 + $0x1b0] ss:$8 sps:$4 sm:$0xff]  }
  0x1f   :  { %665 = vmatprep.subr.bf16.mxu1 %v1344_v23  ;;  %v1362_v35 = vld [vmem:[%s1922_s1 + $0x54] ss:$8 sps:$4 sm:$0xff]   ;;  %v1314_v37 = vld [vmem:[%s1922_s1 + $0x1c4] ss:$8 sps:$4 sm:$0xff]   ;;  %v1367_v38 = vld [vmem:[%s1922_s1 + $0x50] ss:$8 sps:$4 sm:$0xff]  }
  0x20   :  { %v1368_v39 = vld [vmem:[%s1922_s1 + $0x64] ss:$8 sps:$4 sm:$0xff]   ;;  %v1316_v40 = vld [vmem:[%s1922_s1 + $0x1c0] ss:$8 sps:$4 sm:$0xff]   ;;  %v1317_v41 = vld [vmem:[%s1922_s1 + $0x1d4] ss:$8 sps:$4 sm:$0xff]  }
  0x21   :  { %709 = vmatpush1.bf16.msra.mxu0 %v1289_v7  ;;  %v1373_v42 = vld [vmem:[%s1922_s1 + $0x60] ss:$8 sps:$4 sm:$0xff]   ;;  %v1374_v43 = vld [vmem:[%s1922_s1 + $0x74] ss:$8 sps:$4 sm:$0xff]   ;;  %v1319_v44 = vld [vmem:[%s1922_s1 + $0x1d0] ss:$8 sps:$4 sm:$0xff]  }
  0x22   :  { %710 = vmatprep.subr.bf16.mxu0 %v1290_v8  ;;  %666 = vmatpush1.bf16.msra.mxu1 %v1349_v26  ;;  %v1320_v45 = vld [vmem:[%s1922_s1 + $0x1e4] ss:$8 sps:$4 sm:$0xff]   ;;  %v1379_v46 = vld [vmem:[%s1922_s1 + $0x70] ss:$8 sps:$4 sm:$0xff]   ;;  %v1322_v48 = vld [vmem:[%s1922_s1 + $0x1e0] ss:$8 sps:$4 sm:$0xff]  }
  0x23   :  { %667 = vmatprep.subr.bf16.mxu1 %v1350_v27  ;;  %v1380_v47 = vld [vmem:[%s1922_s1 + $0x84] ss:$8 sps:$4 sm:$0xff]   ;;  %v1323_v49 = vld [vmem:[%s1922_s1 + $0x1f4] ss:$8 sps:$4 sm:$0xff]   ;;  %v1385_v50 = vld [vmem:[%s1922_s1 + $0x80] ss:$8 sps:$4 sm:$0xff]  }
  0x24   :  { %v1325_v51 = vld [vmem:[%s1922_s1 + $0x1f0] ss:$8 sps:$4 sm:$0xff]   ;;  %v1386_v52 = vld [vmem:[%s1922_s1 + $0x94] ss:$8 sps:$4 sm:$0xff]   ;;  %v1328_v54 = vld [vmem:[%s1922_s1 + $0x204] ss:$8 sps:$4 sm:$0xff]  }
  0x25   :  { %711 = vmatpush1.bf16.msra.mxu0 %v1292_v9  ;;  %v45_v53 = vld [vmem:[%s1921_s0 + $0x10] sm:$0xff]  ;;  %v1392_v56 = vld [vmem:[%s1922_s1 + $0xa4] ss:$8 sps:$4 sm:$0xff]   ;;  %v1326_v59 = vld [vmem:[%s1922_s1 + $0x200] ss:$8 sps:$4 sm:$0xff]   ;;  %vm1113_vm1 = vcmask 57344  }
  0x26   :  { %712 = vmatprep.subr.bf16.mxu0 %v1293_v10  ;;  %668 = vmatpush1.bf16.msra.mxu1 %v1355_v30  ;;  %v1391_v55 = vld [vmem:[%s1922_s1 + $0x90] ss:$8 sps:$4 sm:$0xff]   ;;  %v52_v57 = vpack.c.bf16 %v45_v53, %v45_v53  ;;  %v48_v58 = vld [vmem:[%s1921_s0 + $0x28] sm:$0xff]  ;;  %v1331_v61 = vld [vmem:[%s1922_s1 + $0x214] ss:$8 sps:$4 sm:$0xff]  }
  0x27   :  { %669 = vmatprep.subr.bf16.mxu1 %v1356_v31  ;;  %v55_v60 = vpack.c.bf16 %v48_v58, %v48_v58  ;;  %v1397_v62 = vld [vmem:[%s1922_s1 + $0xa0] ss:$8 sps:$4 sm:$0xff]   ;;  %v1398_v63 = vld [vmem:[%s1922_s1 + $0xb4] ss:$8 sps:$4 sm:$0xff]   ;;  %v1329_v1 = vld [vmem:[%s1922_s1 + $0x210] ss:$8 sps:$4 sm:$0xff]  }
  0x28   :  { %v44_v0 = vld [vmem:[%s1921_s0 + $0x8] sm:$0xff]  ;;  %v1403_v4 = vld [vmem:[%s1922_s1 + $0xb0] ss:$8 sps:$4 sm:$0xff]   ;;  %v1342_v7 = vld [vmem:[%s1922_s1 + $0x234] ss:$8 sps:$4 sm:$0xff]  }
  0x29   :  { %713 = vmatpush1.bf16.msra.mxu0 %v1295_v11  ;;  %v51_v2 = vpack.c.bf16 %v44_v0, %v44_v0  ;;  %v1336_v3 = vld [vmem:[%s1922_s1 + $0x224] ss:$8 sps:$4 sm:$0xff]   ;;  %v1334_v6 = vld [vmem:[%s1922_s1 + $0x220] ss:$8 sps:$4 sm:$0xff]   ;;  %v1410_v9 = vld [vmem:[%s1922_s1 + $0xd4] ss:$8 sps:$4 sm:$0xff]  }
  0x2a   :  { %714 = vmatprep.subr.bf16.mxu0 %v1296_v12  ;;  %670 = vmatpush1.bf16.msra.mxu1 %v1361_v34  ;;  %v1404_v5 = vld [vmem:[%s1922_s1 + $0xc4] ss:$8 sps:$4 sm:$0xff]   ;;  %v1409_v8 = vld [vmem:[%s1922_s1 + $0xc0] ss:$8 sps:$4 sm:$0xff]   ;;  %v1340_v10 = vld [vmem:[%s1922_s1 + $0x230] ss:$8 sps:$4 sm:$0xff]  }
  0x2b   :  { %671 = vmatprep.subr.bf16.mxu1 %v1362_v35  ;;  %693 = vmatprep.mubr.bf16.mxu1 %v51_v2  ;;  %v1348_v11 = vld [vmem:[%s1922_s1 + $0x244] ss:$8 sps:$4 sm:$0xff]   ;;  %v1415_v12 = vld [vmem:[%s1922_s1 + $0xd0] ss:$8 sps:$4 sm:$0xff]   ;;  %v1346_v14 = vld [vmem:[%s1922_s1 + $0x240] ss:$8 sps:$4 sm:$0xff]  }
  0x2c   :  { %v1416_v13 = vld [vmem:[%s1922_s1 + $0xe4] ss:$8 sps:$4 sm:$0xff]   ;;  %v1422_v17 = vld [vmem:[%s1922_s1 + $0xf4] ss:$8 sps:$4 sm:$0xff]   ;;  %v1424_v20 = vld [vmem:[%s1922_s1 + $0xf0] ss:$8 sps:$4 sm:$0xff]  }
  0x2d   :  { %715 = vmatpush1.bf16.msra.mxu0 %v1298_v15  ;;  %v1354_v15 = vld [vmem:[%s1922_s1 + $0x254] ss:$8 sps:$4 sm:$0xff]   ;;  %v43_v21 = vld [vmem:[%s1921_s0] sm:$0xff]  ;;  %v1428_v30 = vld [vmem:[#allocation3 + $0x10] ss:$8 sps:$4 sm:$0xff]  }
  0x2e   :  { %716 = vmatprep.subr.bf16.mxu0 %v1299_v16  ;;  %672 = vmatpush1.bf16.msra.mxu1 %v1367_v38  ;;  %v1421_v16 = vld [vmem:[%s1922_s1 + $0xe0] ss:$8 sps:$4 sm:$0xff]   ;;  %v1427_v22 = vld [vmem:[#allocation3 + $0x4] ss:$8 sps:$4 sm:$0xff]   ;;  %v1430_v27 = vld [vmem:[#allocation3 + $0x14] ss:$8 sps:$4 sm:$0xff]  }
  0x2f   :  { %673 = vmatprep.subr.bf16.mxu1 %v1368_v39  ;;  %v1358_v23 = vld [vmem:[%s1922_s1 + $0x260] ss:$8 sps:$4 sm:$0xff]   ;;  %v1433_v31 = vld [vmem:[#allocation3 + $0x24] ss:$8 sps:$4 sm:$0xff]   ;;  %v1436_v35 = vld [vmem:[#allocation3 + $0x34] ss:$8 sps:$4 sm:$0xff]  }
  0x30   :  { %v1425_v26 = vld [vmem:[#allocation3] ss:$8 sps:$4 sm:$0xff]   ;;  %v1434_v38 = vld [vmem:[#allocation3 + $0x30] ss:$8 sps:$4 sm:$0xff]   ;;  %v1439_v39 = vld [vmem:[#allocation3 + $0x44] ss:$8 sps:$4 sm:$0xff]  }
  0x31   :  { %717 = vmatpush1.bf16.msra.mxu0 %v1301_v18  ;;  %v1352_v18 = vld [vmem:[%s1922_s1 + $0x250] ss:$8 sps:$4 sm:$0xff]   ;;  %v1431_v34 = vld [vmem:[#allocation3 + $0x20] ss:$8 sps:$4 sm:$0xff]   ;;  %v1408_v53 = vld [vmem:[%s1922_s1 + $0x2e4] ss:$8 sps:$4 sm:$0xff]  }
  0x32   :  { %718 = vmatprep.subr.bf16.mxu0 %v1302_v19  ;;  %674 = vmatpush1.bf16.msra.mxu1 %v1373_v42  ;;  %v1360_v19 = vld [vmem:[%s1922_s1 + $0x264] ss:$8 sps:$4 sm:$0xff]   ;;  %v1437_v42 = vld [vmem:[#allocation3 + $0x40] ss:$8 sps:$4 sm:$0xff]  }
  0x33   :  { %675 = vmatprep.subr.bf16.mxu1 %v1374_v43  ;;  %v1442_v43 = vld [vmem:[#allocation3 + $0x54] ss:$8 sps:$4 sm:$0xff]   ;;  %v1449_v58 = vld [vmem:[#allocation3 + $0x80] ss:$8 sps:$4 sm:$0xff]  }
  0x34   :  { %v1418_v2 = vld [vmem:[%s1922_s1 + $0x300] ss:$8 sps:$4 sm:$0xff]  }
  0x35   :  { %719 = vmatpush1.bf16.msra.mxu0 %v1304_v24  ;;  %v1366_v24 = vld [vmem:[%s1922_s1 + $0x274] ss:$8 sps:$4 sm:$0xff]  }
  0x36   :  { %720 = vmatprep.subr.bf16.mxu0 %v1305_v25  ;;  %676 = vmatpush1.bf16.msra.mxu1 %v1379_v46  ;;  %v50_v25 = vpack.c.bf16 %v43_v21, %v43_v21  ;;  %v1440_v46 = vld [vmem:[#allocation3 + $0x50] ss:$8 sps:$4 sm:$0xff]   ;;  %v157_v21 = vlaneseq }
  0x37   :  { %677 = vmatprep.subr.bf16.mxu1 %v1380_v47  ;;  %v1445_v47 = vld [vmem:[#allocation3 + $0x64] ss:$8 sps:$4 sm:$0xff]  }
  0x39   :  { %721 = vmatpush1.bf16.msra.mxu0 %v1307_v28  ;;  %v1364_v28 = vld [vmem:[%s1922_s1 + $0x270] ss:$8 sps:$4 sm:$0xff]  }
  0x3a   :  { %722 = vmatprep.subr.bf16.mxu0 %v1308_v29  ;;  %678 = vmatpush1.bf16.msra.mxu1 %v1385_v50  ;;  %v1372_v29 = vld [vmem:[%s1922_s1 + $0x284] ss:$8 sps:$4 sm:$0xff]   ;;  %v1443_v50 = vld [vmem:[#allocation3 + $0x60] ss:$8 sps:$4 sm:$0xff]  }
  0x3b   :  { %679 = vmatprep.subr.bf16.mxu1 %v1386_v52  ;;  %v1400_v52 = vld [vmem:[%s1922_s1 + $0x2d0] ss:$8 sps:$4 sm:$0xff]  }
  0x3d   :  { %723 = vmatpush1.bf16.msra.mxu0 %v1310_v32  ;;  %v1370_v32 = vld [vmem:[%s1922_s1 + $0x280] ss:$8 sps:$4 sm:$0xff]  }
  0x3e   :  { %724 = vmatprep.subr.bf16.mxu0 %v1311_v33  ;;  %680 = vmatpush1.bf16.msra.mxu1 %v1391_v55  ;;  %v1378_v33 = vld [vmem:[%s1922_s1 + $0x294] ss:$8 sps:$4 sm:$0xff]   ;;  %v1451_v55 = vld [vmem:[#allocation3 + $0x84] ss:$8 sps:$4 sm:$0xff]  }
  0x3f   :  { %681 = vmatprep.subr.bf16.mxu1 %v1392_v56  ;;  %v1406_v56 = vld [vmem:[%s1922_s1 + $0x2e0] ss:$8 sps:$4 sm:$0xff]  }
  0x41   :  { %725 = vmatpush1.bf16.msra.mxu0 %v1313_v36  ;;  %v1376_v36 = vld [vmem:[%s1922_s1 + $0x290] ss:$8 sps:$4 sm:$0xff]  }
  0x42   :  { %726 = vmatprep.subr.bf16.mxu0 %v1314_v37  ;;  %682 = vmatpush1.bf16.msra.mxu1 %v1397_v62  ;;  %v1384_v37 = vld [vmem:[%s1922_s1 + $0x2a4] ss:$8 sps:$4 sm:$0xff]  }
  0x43   :  { %683 = vmatprep.subr.bf16.mxu1 %v1398_v63  ;;  %v1420_v62 = vld [vmem:[%s1922_s1 + $0x304] ss:$8 sps:$4 sm:$0xff]   ;;  %v1452_v63 = vld [vmem:[#allocation3 + $0x90] ss:$8 sps:$4 sm:$0xff]  }
  0x45   :  { %727 = vmatpush1.bf16.msra.mxu0 %v1316_v40  ;;  %v1382_v40 = vld [vmem:[%s1922_s1 + $0x2a0] ss:$8 sps:$4 sm:$0xff]  }
  0x46   :  { %728 = vmatprep.subr.bf16.mxu0 %v1317_v41  ;;  %684 = vmatpush1.bf16.msra.mxu1 %v1403_v4  ;;  %v1390_v41 = vld [vmem:[%s1922_s1 + $0x2b4] ss:$8 sps:$4 sm:$0xff]  }
  0x47   :  { %685 = vmatprep.subr.bf16.mxu1 %v1404_v5  ;;  %v1460_v4 = vld [vmem:[#allocation3 + $0xb4] ss:$8 sps:$4 sm:$0xff]   ;;  %v1528_v5 = vmov 0  }
  0x49   :  { %729 = vmatpush1.bf16.msra.mxu0 %v1319_v44  ;;  %v1388_v44 = vld [vmem:[%s1922_s1 + $0x2b0] ss:$8 sps:$4 sm:$0xff]  }
  0x4a   :  { %730 = vmatprep.subr.bf16.mxu0 %v1320_v45  ;;  %686 = vmatpush1.bf16.msra.mxu1 %v1409_v8  ;;  %v1396_v45 = vld [vmem:[%s1922_s1 + $0x2c4] ss:$8 sps:$4 sm:$0xff]   ;;  %v49_v8 = vld [vmem:[%s1921_s0 + $0x30] sm:$0xff] }
  0x4b   :  { %687 = vmatprep.subr.bf16.mxu1 %v1410_v9  ;;  %v1461_v9 = vld [vmem:[#allocation3 + $0xc0] ss:$8 sps:$4 sm:$0xff]  }
  0x4d   :  { %731 = vmatpush1.bf16.msra.mxu0 %v1322_v48  ;;  %v1394_v48 = vld [vmem:[%s1922_s1 + $0x2c0] ss:$8 sps:$4 sm:$0xff]  }
  0x4e   :  { %732 = vmatprep.subr.bf16.mxu0 %v1323_v49  ;;  %688 = vmatpush1.bf16.msra.mxu1 %v1415_v12  ;;  %v1402_v49 = vld [vmem:[%s1922_s1 + $0x2d4] ss:$8 sps:$4 sm:$0xff]  }
  0x4f   :  { %689 = vmatprep.subr.bf16.mxu1 %v1416_v13  ;;  %v1466_v12 = vld [vmem:[#allocation3 + $0xd4] ss:$8 sps:$4 sm:$0xff]   ;;  %v1469_v13 = vld [vmem:[#allocation3 + $0xe4] ss:$8 sps:$4 sm:$0xff]  }
  0x51   :  { %733 = vmatpush1.bf16.msra.mxu0 %v1325_v51  ;;  %v1448_v51 = vld [vmem:[#allocation3 + $0x74] ss:$8 sps:$4 sm:$0xff]  }
  0x52   :  { %743 = vmatprep.subr.bf16.mxu0 %v1328_v54  ;;  %690 = vmatpush1.bf16.msra.mxu1 %v1421_v16  ;;  %v1446_v54 = vld [vmem:[#allocation3 + $0x70] ss:$8 sps:$4 sm:$0xff]  }
  0x53   :  { %691 = vmatprep.subr.bf16.mxu1 %v1422_v17  ;;  %v1470_v16 = vld [vmem:[#allocation3 + $0xf0] ss:$8 sps:$4 sm:$0xff]  }
  0x54   :  { %735 = vmatmul.mubr.bf16.vlgmr.msra.gmra.mrb[0].mxu0 %v52_v57  ;;  %v1414_v57 = vld [vmem:[%s1922_s1 + $0x2f4] ss:$8 sps:$4 sm:$0xff]  }
  0x55   :  { %744 = vmatpush1.bf16.msra.mxu0 %v1326_v59  ;;  %775 = vmatprep.mubr.bf16.mxu0 %v55_v60  ;;  %v1454_v59 = vld [vmem:[#allocation3 + $0x94] ss:$8 sps:$4 sm:$0xff]   ;;  %v1412_v60 = vld [vmem:[%s1922_s1 + $0x2f0] ss:$8 sps:$4 sm:$0xff]  }
  0x56   :  { %745 = vmatprep.subr.bf16.mxu0 %v1331_v61  ;;  %692 = vmatpush1.bf16.msra.mxu1 %v1424_v20  ;;  %v47_v61 = vld [vmem:[%s1921_s0 + $0x20] sm:$0xff] }
  0x57   :  { %1035 = vmatprep.subr.bf16.mxu1 %v1427_v22  ;;  %v54_v0 = vpack.c.bf16 %v47_v61, %v47_v61  ;;  %v158_v22 = vshrl.u32 %v157_v21, 7  ;;  %v1098_v61 = vstv %s1927_s6 }
  0x59   :  { %746 = vmatpush1.bf16.msra.mxu0 %v1329_v1  ;;  %694 = vmatmul.mubr.bf16.vlgmr.msra.gmra.mrb[0].mxu1 %v50_v25  ;;  %v1457_v1 = vld [vmem:[#allocation3 + $0xa4] ss:$8 sps:$4 sm:$0xff]   ;;  %v163_v25 = vsub.s32 1, %v158_v22 }
  0x5a   :  { %747 = vmatprep.subr.bf16.mxu0 %v1336_v3  ;;  %1036 = vmatpush1.bf16.msra.mxu1 %v1425_v26  ;;  %v1455_v3 = vld [vmem:[#allocation3 + $0xa0] ss:$8 sps:$4 sm:$0xff]  }
  0x5b   :  { %1037 = vmatprep.subr.bf16.mxu1 %v1430_v27 }
  0x5d   :  { %748 = vmatpush1.bf16.msra.mxu0 %v1334_v6  ;;  %v1458_v6 = vld [vmem:[#allocation3 + $0xb0] ss:$8 sps:$4 sm:$0xff]  }
  0x5e   :  { %749 = vmatprep.subr.bf16.mxu0 %v1342_v7  ;;  %1038 = vmatpush1.bf16.msra.mxu1 %v1428_v30  ;;  %v1463_v7 = vld [vmem:[#allocation3 + $0xc4] ss:$8 sps:$4 sm:$0xff]  }
  0x5f   :  { %1039 = vmatprep.subr.bf16.mxu1 %v1433_v31 }
  0x61   :  { %750 = vmatpush1.bf16.msra.mxu0 %v1340_v10  ;;  %v56_v10 = vpack.c.bf16 %v49_v8, %v49_v8 }
  0x62   :  { %751 = vmatprep.subr.bf16.mxu0 %v1348_v11  ;;  %1040 = vmatpush1.bf16.msra.mxu1 %v1431_v34  ;;  %v1464_v11 = vld [vmem:[#allocation3 + $0xd0] ss:$8 sps:$4 sm:$0xff]  }
  0x63   :  { %1041 = vmatprep.subr.bf16.mxu1 %v1436_v35 }
  0x65   :  { %752 = vmatpush1.bf16.msra.mxu0 %v1346_v14  ;;  %v1467_v14 = vld [vmem:[#allocation3 + $0xe0] ss:$8 sps:$4 sm:$0xff]  }
  0x66   :  { %753 = vmatprep.subr.bf16.mxu0 %v1354_v15  ;;  %1042 = vmatpush1.bf16.msra.mxu1 %v1434_v38  ;;  %v1472_v15 = vld [vmem:[#allocation3 + $0xf4] ss:$8 sps:$4 sm:$0xff]  }
  0x67   :  { %1043 = vmatprep.subr.bf16.mxu1 %v1439_v39 }
  0x69   :  { %754 = vmatpush1.bf16.msra.mxu0 %v1352_v18 }
  0x6a   :  { %755 = vmatprep.subr.bf16.mxu0 %v1360_v19  ;;  %1044 = vmatpush1.bf16.msra.mxu1 %v1437_v42  ;;  %v863_v42 = vld [vmem:[%s1925_s4] sm:$0x3] }
  0x6b   :  { %1045 = vmatprep.subr.bf16.mxu1 %v1442_v43 }
  0x6d   :  { %756 = vmatpush1.bf16.msra.mxu0 %v1358_v23  ;;  %v159_v23 = vsub.s32 0, %v158_v22 }
  0x6e   :  { %757 = vmatprep.subr.bf16.mxu0 %v1366_v24  ;;  %1046 = vmatpush1.bf16.msra.mxu1 %v1440_v46  ;;  %v155_v24 = vld [vmem:[%s1923_s2] sm:$0x3] }
  0x6f   :  { %1047 = vmatprep.subr.bf16.mxu1 %v1445_v47  ;;  %v160_v26 = vrot.slane %v155_v24, %v159_v23  ;;  %v164_v27 = vrot.slane %v155_v24, %v163_v25  ;;  %v868_v43 = vrot.slane %v863_v42, %v159_v23  ;;  %v1080_v46 = vld [vmem:[%s1926_s5] sm:$0x3]  ;;  %s1529_s5 = smov [#allocation6]  }
  0x70   :  { %s1121_s13 = sshll.u32 %s1529_s5, 4  ;;  %s1122_s13 = int_to_ptr.vmem [resolvable:$true] %s1121_s13 }
  0x71   :  { %758 = vmatpush1.bf16.msra.mxu0 %v1364_v28  ;;  %s1499_s14 = scalar_lea.vmem %s1122_s13, 16  ;;  %s1503_s6 = scalar_lea.vmem %s1122_s13, 32 }
  0x72   :  { %759 = vmatprep.subr.bf16.mxu0 %v1372_v29  ;;  %1048 = vmatpush1.bf16.msra.mxu1 %v1443_v50  ;;  %p1500_p8 = scmp.ne.s32.totalorder %s1122_s13, %s1499_s14  ;;  %p1504_p9 = scmp.lt.s32.totalorder %s1122_s13, %s1122_s13 }
  0x73   :  { %1049 = vmatprep.subr.bf16.mxu1 %v1448_v51  ;;  %p1505_p10 = scmp.lt.s32.totalorder %s1503_s6, %s1499_s14 }
  0x75   :  { %760 = vmatpush1.bf16.msra.mxu0 %v1370_v32  ;;  %p1506_p11 = por %p1505_p10, %p1504_p9 }
  0x76   :  { %761 = vmatprep.subr.bf16.mxu0 %v1378_v33  ;;  %1050 = vmatpush1.bf16.msra.mxu1 %v1446_v54 }
  0x77   :  { %1051 = vmatprep.subr.bf16.mxu1 %v1451_v55  ;;  %v1089_v55 = vrot.slane %v1080_v46, %v163_v25  ;;  %p1507_p12 = pnand %p1506_p11, %p1500_p8 }
  0x79   :  { %762 = vmatpush1.bf16.msra.mxu0 %v1376_v36 }
  0x7a   :  { %763 = vmatprep.subr.bf16.mxu0 %v1384_v37  ;;  %1052 = vmatpush1.bf16.msra.mxu1 %v1449_v58 }
  0x7b   :  { %1053 = vmatprep.subr.bf16.mxu1 %v1454_v59 }
  0x7d   :  { %764 = vmatpush1.bf16.msra.mxu0 %v1382_v40 }
  0x7e   :  { %765 = vmatprep.subr.bf16.mxu0 %v1390_v41  ;;  %1054 = vmatpush1.bf16.msra.mxu1 %v1452_v63 }
  0x7f   :  { %1055 = vmatprep.subr.bf16.mxu1 %v1457_v1 }
  0x81   :  { %766 = vmatpush1.bf16.msra.mxu0 %v1388_v44  ;;  %v872_v44 = vrot.slane %v863_v42, %v163_v25 }
  0x82   :  { %767 = vmatprep.subr.bf16.mxu0 %v1396_v45  ;;  %1056 = vmatpush1.bf16.msra.mxu1 %v1455_v3 }
  0x83   :  { %1057 = vmatprep.subr.bf16.mxu1 %v1460_v4  ;;  %v1107_v4 = vand.u32 127, %v157_v21 }
  0x85   :  { %768 = vmatpush1.bf16.msra.mxu0 %v1394_v48 }
  0x86   :  { %769 = vmatprep.subr.bf16.mxu0 %v1402_v49  ;;  %1058 = vmatpush1.bf16.msra.mxu1 %v1458_v6 }
  0x87   :  { %1059 = vmatprep.subr.bf16.mxu1 %v1463_v7 }
  0x89   :  { %770 = vmatpush1.bf16.msra.mxu0 %v1400_v52 }
  0x8a   :  { %771 = vmatprep.subr.bf16.mxu0 %v1408_v53  ;;  %1060 = vmatpush1.bf16.msra.mxu1 %v1461_v9  ;;  %v1085_v53 = vrot.slane %v1080_v46, %v159_v23 }
  0x8b   :  { %1061 = vmatprep.subr.bf16.mxu1 %v1466_v12 }
  0x8d   :  { %772 = vmatpush1.bf16.msra.mxu0 %v1406_v56 }
  0x8e   :  { %773 = vmatprep.subr.bf16.mxu0 %v1414_v57  ;;  %1062 = vmatpush1.bf16.msra.mxu1 %v1464_v11 }
  0x8f   :  { %1063 = vmatprep.subr.bf16.mxu1 %v1469_v13 }
  0x91   :  { %774 = vmatpush1.bf16.msra.mxu0 %v1412_v60 }
  0x92   :  { %784 = vmatprep.subr.bf16.mxu0 %v1420_v62  ;;  %1064 = vmatpush1.bf16.msra.mxu1 %v1467_v14 }
  0x93   :  { %1065 = vmatprep.subr.bf16.mxu1 %v1472_v15 }
  0x94   :  { %776 = vmatmul.mubr.bf16.vlgmr.msra.gmra.mrb[0].mxu0 %v54_v0 }
  0x95   :  { %785 = vmatpush1.bf16.msra.mxu0 %v1418_v2  ;;  %816 = vmatprep.mubr.bf16.mxu0 %v1528_v5  ;;  %v1110_v5 = vsub.s32 %v1107_v4, %v158_v22 }
  0x96   :  { %1066 = vmatpush1.bf16.msra.mxu1 %v1470_v16 }
  0xa0   :  { %1228 = vmatmul.mubr.msk.bf16.vlgmr.msra.gmra.mrb[0].mxu0 %vm657_vm0, %v56_v10 }
 0x12c   :  { %v695_v17 = vpop.f32.mrb[0].mxu1 }
 0x12d   :  { %v697_v18 = vpop.f32.mrb[1].mxu1  ;;  %v696_v28 = vadd.f32 %v695_v17, %v160_v26 }
 0x12e   :  { %v699_v19 = vpop.f32.mrb[2].mxu1  ;;  %v698_v29 = vadd.f32 %v697_v18, %v164_v27 }
 0x12f   :  { %v700_v20 = vpop.f32.mrb[3].mxu1 }
 0x173   :  { %v818_v30 = vpop.f32.mrb[0].mxu0 }
 0x174   :  { %v1262_v31 = vadd.f32 %v818_v30, %v696_v28  ;;  %v820_v32 = vpop.f32.mrb[1].mxu0 }
 0x175   :  { %v1264_v33 = vadd.f32 %v820_v32, %v698_v29  ;;  %v822_v34 = vpop.f32.mrb[2].mxu0 }
 0x176   :  { %v825_v35 = vmul.f32 0.2, %v1262_v31  ;;  %v823_v36 = vpop.f32.mrb[3].mxu0 }
 0x177   :  { %v826_v37 = vmul.f32 0.2, %v1264_v33 }
 0x178   :  { %v827_v38 = vmax.f32 %v1262_v31, %v825_v35 }
 0x179   :  { %v828_v39 = vmax.f32 %v1264_v33, %v826_v37 }
 0x17a   :  { %v829_v41 = vpack.c.bf16 %v827_v38, %v827_v38 }
 0x17b   :  { %v830_v40 = vpack.c.bf16 %v828_v39, %v828_v39 }
 0x17d   :  { %1067 = vmatprep.mubr.bf16.mxu1 %v830_v40 }
 0x17e   :  { %1068 = vmatmul.mubr.bf16.vlgmr.msra.gmra.mrb[4].mxu1 %v829_v41 }
 0x251   :  { %v1069_v45 = vpop.f32.mrb[4].mxu1 }
 0x252   :  { %v1070_v47 = vadd.f32 %v1069_v45, %v868_v43  ;;  %v1071_v48 = vpop.f32.mrb[5].mxu1 }
 0x253   :  { %v1072_v49 = vadd.f32 %v1071_v48, %v872_v44  ;;  %v1073_v50 = vpop.f32.mrb[6].mxu1 }
 0x254   :  { %v1076_v51 = vmul.f32 0.2, %v1070_v47  ;;  %v1074_v52 = vpop.f32.mrb[7].mxu1 }
 0x255   :  { %v1077_v54 = vmul.f32 0.2, %v1072_v49 }
 0x256   :  { %v1078_v56 = vmax.f32 %v1070_v47, %v1076_v51 }
 0x257   :  { %v1079_v57 = vmax.f32 %v1072_v49, %v1077_v54 }
 0x258   :  { %v1092_v58 = vmul.f32 %v1085_v53, %v1078_v56 }
 0x259   :  { %v1093_v59 = vmul.f32 %v1089_v55, %v1079_v57 }
 0x25b   :  { %v1094_v60 = vadd.f32 %v1093_v59, %v1092_v58 }
 0x25d   :  { %1095 = vadd.xlane.f32.xlu0 %v1094_v60 }
 0x2ea   :  { %v1096_v62 = vpop.xlane.xlu0 %1095 }
 0x2eb   :  { %v1099_v63 = vadd.f32 %v1098_v61, %v1096_v62 }
 0x2ed   :  { %v1100_v0 = vsub.f32 0.0, %v1099_v63 }
 0x2ef   :  { %v1101_v1 = vmul.f32 1.442695, %v1100_v0 }
 0x2f1   :  { %1473 = vpow2.f32 %v1101_v1 }
 0x2fb   :  { %v1474_v2 = vpop.eup %1473 }
 0x2fc   :  { %v1103_v3 = vadd.f32 1.0, %v1474_v2 }
 0x2fe   :  { %1475 = vrcp.f32 %v1103_v3 }
 0x308   :  { %v1476_v6 = vpop.eup %1475 }
 0x309   :  { %v1111_v7 = vrot.slane %v1476_v6, %v1110_v5 }
 0x30b   :  { %1114 = vst.msk [vmem:[#allocation6] sm:$0x1] %vm1113_vm1, %v1111_v7 }
 0x30c   :  { %1510 = shalt.err (!%p1507_p12)
}
 0x30d   :  { %s1511_s17 = scalar_lea.hbm %s1928_s7, 16 }
 0x30e   :  { %p1512_p13 = scmp.ne.s32.totalorder %s1928_s7, %s1511_s17  ;;  %p1515_p0 = scmp.lt.u32.totalorder %s1511_s17, %s1928_s7 }
 0x310   :  { %p1517_p1 = pnand %p1515_p0, %p1512_p13 }
 0x312   :  { %1520 = shalt.err (!%p1517_p1)
}
 0x313   :  { %1124 = dma.vmem_to_hbm [thread:$0]  %s1122_s13, 16, %s1928_s7, [#allocation5]  }
 0x314   :  { %1523 = dma.done.wait [#allocation5], 16  }
 0x315   :  { %1524 = vsyncadd [#allocation5], 4294967280 }
 0x316   :  { %1128 = vsyncpa [#allocation4], 1 }
 0x317   :  { %1129 = vsyncpa [#allocation5], 1 }

</bundles_post_ra>
